<compile_context>
chip_gen: v7x
topology: tpu7x:2x2x1
jax: 0.10.0
libtpu: 0.0.40
codegen_flags: <defaults>
</compile_context>

<pallas_src>
import functools

import jax
import jax.numpy as jnp
from jax.experimental import pallas as pl
from jax.experimental.pallas import tpu as pltpu

LANE = 128            # TPU lane width; all feature dims are padded to this
NEG_BIG = -1e30       # finite "minus infinity" for the masked log_softmax


def _round_up(n, m):
    return ((n + m - 1) // m) * m


def _mlp_kernel(x_ref, w0_ref, wr_ref, b_ref, o_ref, *, num_cls):
    """One batch tile: 6 fused Linear+ReLU layers + masked log_softmax.

    x_ref : [bm, Fin_pad]   f32
    w0_ref: [Fin_pad, 128]  f32   (fc0 weight, [in, out] layout)
    wr_ref: [5, 128, 128]   f32   (fc1..fc5 weights, zero padded)
    b_ref : [6, 128]        f32   (all biases, zero padded)
    o_ref : [bm, 128]       f32   (padded log_softmax; valid lanes = [:num_cls])
    """
    # Layer 0: [bm, Fin_pad] @ [Fin_pad, 128] -> [bm, 128]
    h = jnp.dot(x_ref[...], w0_ref[...], preferred_element_type=jnp.float32) + b_ref[0]
    h = jnp.maximum(h, 0.0)

    # Layers 1..5: all operate on the 128-lane padded slab (padding stays zero).
    for j in range(wr_ref.shape[0]):
        h = jnp.dot(h, wr_ref[j], preferred_element_type=jnp.float32) + b_ref[j + 1]
        h = jnp.maximum(h, 0.0)

    # log_softmax over dim=1, restricted to the first num_cls lanes.
    lane = jax.lax.broadcasted_iota(jnp.int32, h.shape, 1)
    valid = lane < num_cls
    hm = jnp.where(valid, h, jnp.float32(NEG_BIG))
    m = jnp.max(hm, axis=-1, keepdims=True)
    shifted = hm - m
    e = jnp.where(valid, jnp.exp(shifted), jnp.float32(0.0))
    lse = jnp.log(jnp.sum(e, axis=-1, keepdims=True))
    o_ref[...] = shifted - lse


def pack_params(params, image_size, num_cls):
    """Pack the 6 (w, b) pairs into the 3 padded operand slabs."""
    dims = [image_size, 128, 64, 10, 10, 10, num_cls]
    assert num_cls <= LANE, "num_cls must fit in one 128-lane slab"
    fin_pad = _round_up(image_size, LANE)

    w0_pad = jnp.zeros((fin_pad, LANE), jnp.float32)
    w0_pad = w0_pad.at[:dims[0], :dims[1]].set(params["w0"])

    w_rest = jnp.zeros((5, LANE, LANE), jnp.float32)
    for j in range(1, 6):
        w_rest = w_rest.at[j - 1, :dims[j], :dims[j + 1]].set(params[f"w{j}"])

    b_all = jnp.zeros((6, LANE), jnp.float32)
    for j in range(6):
        b_all = b_all.at[j, :dims[j + 1]].set(params[f"b{j}"])

    return w0_pad, w_rest, b_all


def model_e_forward(x, params, image_size, num_cls=10):
    """x: anything reshapeable to [-1, image_size]. Returns [B, num_cls] log-probs."""
    x = x.reshape(-1, image_size).astype(jnp.float32)
    B = x.shape[0]

    fin_pad = _round_up(image_size, LANE)
    bm = min(256, _round_up(B, 8))          # batch tile (rows per grid step)
    b_pad = _round_up(B, bm)
    grid = (b_pad // bm,)

    # Pad x to [B_pad, Fin_pad]; padded rows/cols are zero and provably inert.
    x_pad = jnp.zeros((b_pad, fin_pad), jnp.float32).at[:B, :image_size].set(x)
    w0_pad, w_rest, b_all = pack_params(params, image_size, num_cls)

    # Rough VMEM footprint (double-buffered I/O + resident weights), with headroom.
    vmem_bytes = 4 * (2 * bm * fin_pad + 2 * bm * LANE
                      + fin_pad * LANE + 5 * LANE * LANE + 6 * LANE)
    vmem_limit = min(64 * 1024 * 1024, max(4 * 1024 * 1024, 4 * vmem_bytes))

    out_pad = pl.pallas_call(
        functools.partial(_mlp_kernel, num_cls=num_cls),
        out_shape=jax.ShapeDtypeStruct((b_pad, LANE), jnp.float32),
        grid=grid,
        in_specs=[
            pl.BlockSpec((bm, fin_pad), lambda i: (i, 0)),        # x tile
            pl.BlockSpec((fin_pad, LANE), lambda i: (0, 0)),      # fc0 weight (resident)
            pl.BlockSpec((5, LANE, LANE), lambda i: (0, 0, 0)),   # fc1..fc5 weights
            pl.BlockSpec((6, LANE), lambda i: (0, 0)),            # all biases
        ],
        out_specs=pl.BlockSpec((bm, LANE), lambda i: (i, 0)),
        compiler_params=pltpu.CompilerParams(
            dimension_semantics=("parallel",),
            vmem_limit_bytes=int(vmem_limit),
        ),
    )(x_pad, w0_pad, w_rest, b_all)

    return out_pad[:B, :num_cls]


def init_params(key, image_size, num_cls=10):
    """PyTorch nn.Linear default init: U(-1/sqrt(fan_in), 1/sqrt(fan_in)) for w and b."""
    dims = [image_size, 128, 64, 10, 10, 10, num_cls]
    params = {}
    for i in range(6):
        fin, fout = dims[i], dims[i + 1]
        key, kw, kb = jax.random.split(key, 3)
        bound = 1.0 / jnp.sqrt(jnp.float32(fin))
        # stored as [in, out] so the kernel computes x @ W + b
        params[f"w{i}"] = jax.random.uniform(kw, (fin, fout), jnp.float32, -bound, bound)
        params[f"b{i}"] = jax.random.uniform(kb, (fout,), jnp.float32, -bound, bound)
    return params


def _reference_forward(x, params, image_size):
    """Pure-JAX reference mirroring ModelE.forward."""
    h = x.reshape(-1, image_size).astype(jnp.float32)
    for i in range(6):
        h = h @ params[f"w{i}"] + params[f"b{i}"]
        h = jnp.maximum(h, 0.0)
    return jax.nn.log_softmax(h, axis=-1)


if __name__ == "__main__":
    image_size = 64   # e.g. 8x8 flattened images
    num_cls = 10
    batch = 8

    key = jax.random.PRNGKey(0)
    key, kx = jax.random.split(key)
    x = jax.random.normal(kx, (batch, image_size), jnp.float32)
    params = init_params(key, image_size, num_cls)

    out = model_e_forward(x, params, image_size, num_cls)
    out = jax.block_until_ready(out)

    ref = _reference_forward(x, params, image_size)
    assert out.shape == (batch, num_cls)
    assert jnp.allclose(out, ref, atol=1e-4, rtol=1e-4), "mismatch vs reference"

    print("KERNEL_OK")
</pallas_src>

<mosaic_0001>
module attributes {stable_mosaic.version = 11 : i64} {
  func.func @_mlp_kernel(%arg0: i32, %arg1: memref<8x128xf32, #tpu.memory_space<vmem>>, %arg2: memref<128x128xf32, #tpu.memory_space<vmem>>, %arg3: memref<5x128x128xf32, #tpu.memory_space<vmem>>, %arg4: memref<6x128xf32, #tpu.memory_space<vmem>>, %arg5: memref<8x128xf32, #tpu.memory_space<vmem>>) attributes {dimension_semantics = [#tpu.dimension_semantics<parallel>], iteration_bounds = array<i64: 1>, scalar_prefetch = 0 : i64, scratch_operands = 0 : i64, tpu.core_type = #tpu.core_type<tc>, window_params = [{transform_indices = @transform_0, window_bounds = array<i64: 8, 128>}, {pipeline_mode = #tpu.pipeline_mode<synchronous>, transform_indices = @transform_1, window_bounds = array<i64: 128, 128>}, {pipeline_mode = #tpu.pipeline_mode<synchronous>, transform_indices = @transform_2, window_bounds = array<i64: 5, 128, 128>}, {pipeline_mode = #tpu.pipeline_mode<synchronous>, transform_indices = @transform_3, window_bounds = array<i64: 6, 128>}, {transform_indices = @transform_4, window_bounds = array<i64: 8, 128>}]} {
    %c0 = arith.constant 0 : index
    %c0_0 = arith.constant 0 : index
    %0 = vector.load %arg1[%c0, %c0_0] : memref<8x128xf32, #tpu.memory_space<vmem>>, vector<8x128xf32>
    %c0_1 = arith.constant 0 : index
    %c0_2 = arith.constant 0 : index
    %1 = vector.load %arg2[%c0_1, %c0_2] : memref<128x128xf32, #tpu.memory_space<vmem>>, vector<128x128xf32>
    %cst = arith.constant dense<0.000000e+00> : vector<8x128xf32>
    %2 = tpu.matmul %0, %1, %cst {dimension_numbers = #tpu.dot_dimension_numbers<[1], [0], [0], [1], [0, 0, 1, 1], [], []>} : vector<8x128xf32>, vector<128x128xf32>, vector<8x128xf32> -> vector<8x128xf32>
    %c0_3 = arith.constant 0 : index
    %c0_4 = arith.constant 0 : index
    %3 = vector.load %arg4[%c0_3, %c0_4] : memref<6x128xf32, #tpu.memory_space<vmem>>, vector<1x128xf32>
    %4 = vector.shape_cast %3 : vector<1x128xf32> to vector<128xf32>
    %5 = vector.shape_cast %4 : vector<128xf32> to vector<1x128xf32>
    %6 = vector.broadcast %5 : vector<1x128xf32> to vector<8x128xf32>
    %7 = arith.addf %2, %6 : vector<8x128xf32>
    %cst_5 = arith.constant 0.000000e+00 : f32
    %8 = vector.broadcast %cst_5 : f32 to vector<8x128xf32>
    %9 = arith.maximumf %7, %8 : vector<8x128xf32>
    %c0_6 = arith.constant 0 : index
    %c0_7 = arith.constant 0 : index
    %c0_8 = arith.constant 0 : index
    %10 = vector.load %arg3[%c0_6, %c0_7, %c0_8] : memref<5x128x128xf32, #tpu.memory_space<vmem>>, vector<1x128x128xf32>
    %11 = vector.shape_cast %10 : vector<1x128x128xf32> to vector<128x128xf32>
    %cst_9 = arith.constant dense<0.000000e+00> : vector<8x128xf32>
    %12 = tpu.matmul %9, %11, %cst_9 {dimension_numbers = #tpu.dot_dimension_numbers<[1], [0], [0], [1], [0, 0, 1, 1], [], []>} : vector<8x128xf32>, vector<128x128xf32>, vector<8x128xf32> -> vector<8x128xf32>
    %c1 = arith.constant 1 : index
    %c0_10 = arith.constant 0 : index
    %13 = vector.load %arg4[%c1, %c0_10] : memref<6x128xf32, #tpu.memory_space<vmem>>, vector<1x128xf32>
    %14 = vector.shape_cast %13 : vector<1x128xf32> to vector<128xf32>
    %15 = vector.shape_cast %14 : vector<128xf32> to vector<1x128xf32>
    %16 = vector.broadcast %15 : vector<1x128xf32> to vector<8x128xf32>
    %17 = arith.addf %12, %16 : vector<8x128xf32>
    %cst_11 = arith.constant 0.000000e+00 : f32
    %18 = vector.broadcast %cst_11 : f32 to vector<8x128xf32>
    %19 = arith.maximumf %17, %18 : vector<8x128xf32>
    %c1_12 = arith.constant 1 : index
    %c0_13 = arith.constant 0 : index
    %c0_14 = arith.constant 0 : index
    %20 = vector.load %arg3[%c1_12, %c0_13, %c0_14] : memref<5x128x128xf32, #tpu.memory_space<vmem>>, vector<1x128x128xf32>
    %21 = vector.shape_cast %20 : vector<1x128x128xf32> to vector<128x128xf32>
    %cst_15 = arith.constant dense<0.000000e+00> : vector<8x128xf32>
    %22 = tpu.matmul %19, %21, %cst_15 {dimension_numbers = #tpu.dot_dimension_numbers<[1], [0], [0], [1], [0, 0, 1, 1], [], []>} : vector<8x128xf32>, vector<128x128xf32>, vector<8x128xf32> -> vector<8x128xf32>
    %c2 = arith.constant 2 : index
    %c0_16 = arith.constant 0 : index
    %23 = vector.load %arg4[%c2, %c0_16] : memref<6x128xf32, #tpu.memory_space<vmem>>, vector<1x128xf32>
    %24 = vector.shape_cast %23 : vector<1x128xf32> to vector<128xf32>
    %25 = vector.shape_cast %24 : vector<128xf32> to vector<1x128xf32>
    %26 = vector.broadcast %25 : vector<1x128xf32> to vector<8x128xf32>
    %27 = arith.addf %22, %26 : vector<8x128xf32>
    %cst_17 = arith.constant 0.000000e+00 : f32
    %28 = vector.broadcast %cst_17 : f32 to vector<8x128xf32>
    %29 = arith.maximumf %27, %28 : vector<8x128xf32>
    %c2_18 = arith.constant 2 : index
    %c0_19 = arith.constant 0 : index
    %c0_20 = arith.constant 0 : index
    %30 = vector.load %arg3[%c2_18, %c0_19, %c0_20] : memref<5x128x128xf32, #tpu.memory_space<vmem>>, vector<1x128x128xf32>
    %31 = vector.shape_cast %30 : vector<1x128x128xf32> to vector<128x128xf32>
    %cst_21 = arith.constant dense<0.000000e+00> : vector<8x128xf32>
    %32 = tpu.matmul %29, %31, %cst_21 {dimension_numbers = #tpu.dot_dimension_numbers<[1], [0], [0], [1], [0, 0, 1, 1], [], []>} : vector<8x128xf32>, vector<128x128xf32>, vector<8x128xf32> -> vector<8x128xf32>
    %c3 = arith.constant 3 : index
    %c0_22 = arith.constant 0 : index
    %33 = vector.load %arg4[%c3, %c0_22] : memref<6x128xf32, #tpu.memory_space<vmem>>, vector<1x128xf32>
    %34 = vector.shape_cast %33 : vector<1x128xf32> to vector<128xf32>
    %35 = vector.shape_cast %34 : vector<128xf32> to vector<1x128xf32>
    %36 = vector.broadcast %35 : vector<1x128xf32> to vector<8x128xf32>
    %37 = arith.addf %32, %36 : vector<8x128xf32>
    %cst_23 = arith.constant 0.000000e+00 : f32
    %38 = vector.broadcast %cst_23 : f32 to vector<8x128xf32>
    %39 = arith.maximumf %37, %38 : vector<8x128xf32>
    %c3_24 = arith.constant 3 : index
    %c0_25 = arith.constant 0 : index
    %c0_26 = arith.constant 0 : index
    %40 = vector.load %arg3[%c3_24, %c0_25, %c0_26] : memref<5x128x128xf32, #tpu.memory_space<vmem>>, vector<1x128x128xf32>
    %41 = vector.shape_cast %40 : vector<1x128x128xf32> to vector<128x128xf32>
    %cst_27 = arith.constant dense<0.000000e+00> : vector<8x128xf32>
    %42 = tpu.matmul %39, %41, %cst_27 {dimension_numbers = #tpu.dot_dimension_numbers<[1], [0], [0], [1], [0, 0, 1, 1], [], []>} : vector<8x128xf32>, vector<128x128xf32>, vector<8x128xf32> -> vector<8x128xf32>
    %c4 = arith.constant 4 : index
    %c0_28 = arith.constant 0 : index
    %43 = vector.load %arg4[%c4, %c0_28] : memref<6x128xf32, #tpu.memory_space<vmem>>, vector<1x128xf32>
    %44 = vector.shape_cast %43 : vector<1x128xf32> to vector<128xf32>
    %45 = vector.shape_cast %44 : vector<128xf32> to vector<1x128xf32>
    %46 = vector.broadcast %45 : vector<1x128xf32> to vector<8x128xf32>
    %47 = arith.addf %42, %46 : vector<8x128xf32>
    %cst_29 = arith.constant 0.000000e+00 : f32
    %48 = vector.broadcast %cst_29 : f32 to vector<8x128xf32>
    %49 = arith.maximumf %47, %48 : vector<8x128xf32>
    %c4_30 = arith.constant 4 : index
    %c0_31 = arith.constant 0 : index
    %c0_32 = arith.constant 0 : index
    %50 = vector.load %arg3[%c4_30, %c0_31, %c0_32] : memref<5x128x128xf32, #tpu.memory_space<vmem>>, vector<1x128x128xf32>
    %51 = vector.shape_cast %50 : vector<1x128x128xf32> to vector<128x128xf32>
    %cst_33 = arith.constant dense<0.000000e+00> : vector<8x128xf32>
    %52 = tpu.matmul %49, %51, %cst_33 {dimension_numbers = #tpu.dot_dimension_numbers<[1], [0], [0], [1], [0, 0, 1, 1], [], []>} : vector<8x128xf32>, vector<128x128xf32>, vector<8x128xf32> -> vector<8x128xf32>
    %c5 = arith.constant 5 : index
    %c0_34 = arith.constant 0 : index
    %53 = vector.load %arg4[%c5, %c0_34] : memref<6x128xf32, #tpu.memory_space<vmem>>, vector<1x128xf32>
    %54 = vector.shape_cast %53 : vector<1x128xf32> to vector<128xf32>
    %55 = vector.shape_cast %54 : vector<128xf32> to vector<1x128xf32>
    %56 = vector.broadcast %55 : vector<1x128xf32> to vector<8x128xf32>
    %57 = arith.addf %52, %56 : vector<8x128xf32>
    %cst_35 = arith.constant 0.000000e+00 : f32
    %58 = vector.broadcast %cst_35 : f32 to vector<8x128xf32>
    %59 = arith.maximumf %57, %58 : vector<8x128xf32>
    %60 = tpu.iota {dimensions = array<i32: 1>} : vector<8x128xi32>
    %c10_i32 = arith.constant 10 : i32
    %61 = vector.broadcast %c10_i32 : i32 to vector<8x128xi32>
    %62 = arith.cmpi slt, %60, %61 : vector<8x128xi32>
    %cst_36 = arith.constant -1.000000e+30 : f32
    %63 = vector.broadcast %cst_36 : f32 to vector<8x128xf32>
    %64 = arith.select %62, %59, %63 : vector<8x128xi1>, vector<8x128xf32>
    %cst_37 = arith.constant dense<0xFF800000> : vector<8xf32>
    %65 = vector.multi_reduction <maximumf>, %64, %cst_37 [1] : vector<8x128xf32> to vector<8xf32>
    %66 = vector.shape_cast %65 : vector<8xf32> to vector<8x1xf32>
    %67 = vector.broadcast %66 : vector<8x1xf32> to vector<8x128xf32>
    %68 = arith.subf %64, %67 : vector<8x128xf32>
    %69 = math.exp %68 : vector<8x128xf32>
    %cst_38 = arith.constant 0.000000e+00 : f32
    %70 = vector.broadcast %cst_38 : f32 to vector<8x128xf32>
    %71 = arith.select %62, %69, %70 : vector<8x128xi1>, vector<8x128xf32>
    %cst_39 = arith.constant dense<0.000000e+00> : vector<8xf32>
    %72 = vector.multi_reduction <add>, %71, %cst_39 [1] : vector<8x128xf32> to vector<8xf32>
    %73 = vector.shape_cast %72 : vector<8xf32> to vector<8x1xf32>
    %74 = math.log %73 : vector<8x1xf32>
    %75 = vector.broadcast %74 : vector<8x1xf32> to vector<8x128xf32>
    %76 = arith.subf %68, %75 : vector<8x128xf32>
    %c0_40 = arith.constant 0 : index
    %c0_41 = arith.constant 0 : index
    %77 = vector.load %arg5[%c0_40, %c0_41] : memref<8x128xf32, #tpu.memory_space<vmem>>, vector<8x128xf32>
    tpu.vector_store %arg5[%c0_40, %c0_41], %76 {strides = array<i32>} : memref<8x128xf32, #tpu.memory_space<vmem>>, vector<8x128xf32>,
    return
  }
  func.func @transform_0(%arg0: i32) -> (i32, i32) {
    %c0_i32 = arith.constant 0 : i32
    %c0_i32_0 = arith.constant 0 : i32
    return %arg0, %c0_i32 : i32, i32
  }
  func.func @transform_1(%arg0: i32) -> (i32, i32) {
    %c0_i32 = arith.constant 0 : i32
    %c0_i32_0 = arith.constant 0 : i32
    %c0_i32_1 = arith.constant 0 : i32
    return %c0_i32, %c0_i32_0 : i32, i32
  }
  func.func @transform_2(%arg0: i32) -> (i32, i32, i32) {
    %c0_i32 = arith.constant 0 : i32
    %c0_i32_0 = arith.constant 0 : i32
    %c0_i32_1 = arith.constant 0 : i32
    %c0_i32_2 = arith.constant 0 : i32
    return %c0_i32, %c0_i32_0, %c0_i32_1 : i32, i32, i32
  }
  func.func @transform_3(%arg0: i32) -> (i32, i32) {
    %c0_i32 = arith.constant 0 : i32
    %c0_i32_0 = arith.constant 0 : i32
    %c0_i32_1 = arith.constant 0 : i32
    return %c0_i32, %c0_i32_0 : i32, i32
  }
  func.func @transform_4(%arg0: i32) -> (i32, i32) {
    %c0_i32 = arith.constant 0 : i32
    %c0_i32_0 = arith.constant 0 : i32
    return %arg0, %c0_i32 : i32, i32
  }
}

</mosaic_0001>

<bundles_post_ra>
// kernel: tpu_custom_call.1
= control target key start
LH: loop header
LB: loop body
LE: loop exit
PB: predicated region body
PF: predicated region fallthrough
CT: control target
= control target key end

     0   :  { %9 = vsyncpa [#allocation3], 0  ;;  %s1381_s0 = inlined_call_operand.hbm [shape: f32[8,128], index: 0, kind: input, shape index: {}]   ;;  %s1382_s1 = inlined_call_operand.hbm [shape: f32[128,128], index: 1, kind: input, shape index: {}]   ;;  %s1383_s2 = inlined_call_operand.hbm [shape: f32[5,128,128], index: 2, kind: input, shape index: {}]   ;;  %s1384_s3 = inlined_call_operand.vmem [shape: f32[6,128], index: 3, kind: input, shape index: {}]   ;;  %s1385_s4 = inlined_call_operand.hbm [shape: f32[8,128], index: 4, kind: output, shape index: {}]  }
   0x1   :  { %10 = vsyncpa [#allocation6], 0 }
   0x2   :  { %11 = vsyncpa [#allocation4], 0  ;;  %s1215_s15 = smov [#allocation5]   ;;  %s1121_s19 = scalar_lea.hbm %s1382_s1, 2048 }
   0x3   :  { %s27_s16 = sshll.u32 %s1215_s15, 4  ;;  %p1122_p0 = scmp.ne.s32.totalorder %s1382_s1, %s1121_s19  ;;  %s28_s16 = int_to_ptr.vmem [resolvable:$true] %s27_s16 }
   0x4   :  { %p1125_p1 = scmp.lt.u32.totalorder %s1121_s19, %s1382_s1 }
   0x6   :  { %p1127_p2 = pnand %p1125_p1, %p1122_p0 }
   0x8   :  { %1130 = shalt.err (!%p1127_p2)
}
   0x9   :  { %s1131_s24 = scalar_lea.vmem %s28_s16, 2048  ;;  %p1136_p4 = scmp.lt.s32.totalorder %s28_s16, %s28_s16 }
   0xa   :  { %p1132_p3 = scmp.ne.s32.totalorder %s28_s16, %s1131_s24  ;;  %p1137_p5 = scmp.lt.s32.totalorder %s1131_s24, %s1131_s24 }
   0xc   :  { %p1138_p6 = por %p1137_p5, %p1136_p4 }
   0xe   :  { %p1139_p7 = pnand %p1138_p6, %p1132_p3 }
  0x10   :  { %1142 = shalt.err (!%p1139_p7)
}
  0x11   :  { %s1216_s25 = smov 128   ;;  %s1217_s26 = smov 8  }
  0x12   :  { %33 = dma.hbm_to_vmem [thread:$0]  %s1382_s1, 2048, %s28_s16, [#allocation6], %s1216_s25, %s1216_s25, %s1217_s26  }
  0x13   :  { %s1218_s29 = smov [#allocation2]   ;;  %s1219_s5 = smov [#allocation7]  }
  0x14   :  { %s18_s30 = sshll.u32 %s1218_s29, 4  ;;  %s39_s6 = sshll.u32 %s1219_s5, 4  ;;  %s19_s30 = int_to_ptr.vmem [resolvable:$true] %s18_s30  ;;  %s40_s6 = int_to_ptr.vmem [resolvable:$true] %s39_s6 }
  0x15   :  { %s1143_s9 = scalar_lea.hbm %s1381_s0, 128 }
  0x16   :  { %p1144_p8 = scmp.ne.s32.totalorder %s1381_s0, %s1143_s9  ;;  %p1147_p9 = scmp.lt.u32.totalorder %s1143_s9, %s1381_s0 }
  0x18   :  { %p1149_p10 = pnand %p1147_p9, %p1144_p8 }
  0x1a   :  { %1152 = shalt.err (!%p1149_p10)
}
  0x1b   :  { %s1153_s1 = scalar_lea.vmem %s19_s30, 128  ;;  %p1158_p12 = scmp.lt.s32.totalorder %s19_s30, %s19_s30 }
  0x1c   :  { %p1154_p11 = scmp.ne.s32.totalorder %s19_s30, %s1153_s1  ;;  %p1159_p13 = scmp.lt.s32.totalorder %s1153_s1, %s1153_s1 }
  0x1e   :  { %p1160_p0 = por %p1159_p13, %p1158_p12 }
  0x20   :  { %p1161_p1 = pnand %p1160_p0, %p1154_p11 }
  0x22   :  { %1164 = shalt.err (!%p1161_p1)
}
  0x23   :  { %21 = dma.hbm_to_vmem [thread:$0]  %s1381_s0, 128, %s19_s30, [#allocation3]  }
  0x24   :  { %s1165_s18 = scalar_lea.hbm %s1383_s2, 10240 }
  0x25   :  { %p1166_p2 = scmp.ne.s32.totalorder %s1383_s2, %s1165_s18  ;;  %p1169_p3 = scmp.lt.u32.totalorder %s1165_s18, %s1383_s2 }
  0x27   :  { %p1171_p4 = pnand %p1169_p3, %p1166_p2 }
  0x29   :  { %1174 = shalt.err (!%p1171_p4)
}
  0x2a   :  { %s1175_s23 = scalar_lea.vmem %s40_s6, 10240  ;;  %p1180_p6 = scmp.lt.s32.totalorder %s40_s6, %s40_s6 }
  0x2b   :  { %p1176_p5 = scmp.ne.s32.totalorder %s40_s6, %s1175_s23  ;;  %p1181_p7 = scmp.lt.s32.totalorder %s1175_s23, %s1175_s23 }
  0x2d   :  { %p1182_p8 = por %p1181_p7, %p1180_p6 }
  0x2f   :  { %p1183_p9 = pnand %p1182_p8, %p1176_p5 }
  0x31   :  { %1186 = shalt.err (!%p1183_p9)
}
  0x32   :  { %45 = dma.hbm_to_vmem [thread:$0]  %s1383_s2, 10240, %s40_s6, [#allocation6], %s1216_s25, %s1216_s25, %s1217_s26  }
  0x33   :  { %1209 = dma.done.wait [#allocation3], 128  }
  0x34   :  { %1210 = vsyncadd [#allocation3], 4294967168 }
  0x35   :  { %1211 = dma.done.wait [#allocation6], 12288  }
  0x36   :  { %1212 = vsyncadd [#allocation6], 4294955008  ;;  %v1220_v0 = vmov 0.0|0.0   ;;  %vm1221_vm0 = vmmov 0   ;;  %v1222_v1 = vmov 0.0   ;;  %v58_v2 = vld [vmem:[#allocation5] sm:$0xff] }
  0x37   :  { %964 = vmatprep.subr.bf16.mxu0 %v1220_v0  ;;  %786 = vmatprep.mubr.msk.f32.mxu0 %vm1221_vm0, %v1222_v1  ;;  %v59_v3 = vld [vmem:[#allocation5 + $0x8] sm:$0xff]  ;;  %v60_v4 = vld [vmem:[#allocation5 + $0x10] sm:$0xff]  ;;  %v61_v6 = vld [vmem:[#allocation5 + $0x18] sm:$0xff]  ;;  %s1223_s10 = smov [#allocation8]  }
  0x38   :  { %988 = vmatprep.subr.bf16.mxu1 %v1220_v0  ;;  %821 = vmatprep.mubr.msk.f32.mxu1 %vm1221_vm0, %v1222_v1  ;;  %v965_v5 = vpack.c.bf16 %v59_v3, %v58_v2  ;;  %v968_v7 = vpack.c.bf16 %v61_v6, %v60_v4  ;;  %v62_v8 = vld [vmem:[#allocation5 + $0x20] sm:$0xff]  ;;  %v63_v9 = vld [vmem:[#allocation5 + $0x28] sm:$0xff]  ;;  %v152_v12 = vld [vmem:[#allocation7 + $0x10] sm:$0xff] }
  0x39   :  { %v150_v10 = vld [vmem:[#allocation7] sm:$0xff]  ;;  %v151_v11 = vld [vmem:[#allocation7 + $0x8] sm:$0xff]  ;;  %v153_v13 = vld [vmem:[#allocation7 + $0x18] sm:$0xff]  ;;  %v971_v14 = vpack.c.bf16 %v63_v9, %v62_v8 }
  0x3a   :  { %966 = vmatpush3.bf16.msra.mxu0 %v965_v5  ;;  %v989_v15 = vpack.c.bf16 %v151_v11, %v150_v10  ;;  %v64_v16 = vld [vmem:[#allocation5 + $0x30] sm:$0xff]  ;;  %v65_v17 = vld [vmem:[#allocation5 + $0x38] sm:$0xff]  ;;  %v992_v18 = vpack.c.bf16 %v153_v13, %v152_v12  ;;  %v154_v19 = vld [vmem:[#allocation7 + $0x20] sm:$0xff] }
  0x3b   :  { %967 = vmatprep.subr.bf16.mxu0 %v1220_v0  ;;  %v155_v20 = vld [vmem:[#allocation7 + $0x28] sm:$0xff]  ;;  %v974_v21 = vpack.c.bf16 %v65_v17, %v64_v16  ;;  %v66_v22 = vld [vmem:[#allocation5 + $0x40] sm:$0xff]  ;;  %v156_v25 = vld [vmem:[#allocation7 + $0x30] sm:$0xff] }
  0x3c   :  { %990 = vmatpush3.bf16.msra.mxu1 %v989_v15  ;;  %v67_v23 = vld [vmem:[#allocation5 + $0x48] sm:$0xff]  ;;  %v995_v24 = vpack.c.bf16 %v155_v20, %v154_v19  ;;  %v157_v26 = vld [vmem:[#allocation7 + $0x38] sm:$0xff]  ;;  %v68_v28 = vld [vmem:[#allocation5 + $0x50] sm:$0xff] }
  0x3d   :  { %991 = vmatprep.subr.bf16.mxu1 %v1220_v0  ;;  %v977_v27 = vpack.c.bf16 %v67_v23, %v66_v22  ;;  %v69_v29 = vld [vmem:[#allocation5 + $0x58] sm:$0xff]  ;;  %v998_v30 = vpack.c.bf16 %v157_v26, %v156_v25  ;;  %v158_v31 = vld [vmem:[#allocation7 + $0x40] sm:$0xff]  ;;  %v159_v32 = vld [vmem:[#allocation7 + $0x48] sm:$0xff] }
  0x3e   :  { %969 = vmatpush3.bf16.msra.mxu0 %v968_v7  ;;  %v980_v33 = vpack.c.bf16 %v69_v29, %v68_v28  ;;  %v70_v34 = vld [vmem:[#allocation5 + $0x60] sm:$0xff]  ;;  %v71_v35 = vld [vmem:[#allocation5 + $0x68] sm:$0xff]  ;;  %v1001_v36 = vpack.c.bf16 %v159_v32, %v158_v31  ;;  %v160_v37 = vld [vmem:[#allocation7 + $0x50] sm:$0xff] }
  0x3f   :  { %970 = vmatprep.subr.bf16.mxu0 %v1220_v0  ;;  %v161_v38 = vld [vmem:[#allocation7 + $0x58] sm:$0xff]  ;;  %v983_v39 = vpack.c.bf16 %v71_v35, %v70_v34  ;;  %v72_v40 = vld [vmem:[#allocation5 + $0x70] sm:$0xff]  ;;  %v162_v43 = vld [vmem:[#allocation7 + $0x60] sm:$0xff] }
  0x40   :  { %993 = vmatpush3.bf16.msra.mxu1 %v992_v18  ;;  %v73_v41 = vld [vmem:[#allocation5 + $0x78] sm:$0xff]  ;;  %v1004_v42 = vpack.c.bf16 %v161_v38, %v160_v37  ;;  %v163_v44 = vld [vmem:[#allocation7 + $0x68] sm:$0xff]  ;;  %v164_v48 = vld [vmem:[#allocation7 + $0x70] sm:$0xff] }
  0x41   :  { %994 = vmatprep.subr.bf16.mxu1 %v1220_v0  ;;  %v986_v45 = vpack.c.bf16 %v73_v41, %v72_v40  ;;  %v1007_v46 = vpack.c.bf16 %v163_v44, %v162_v43  ;;  %v57_v47 = vld [vmem:[#allocation2] sm:$0xff]  ;;  %v243_v51 = vld [vmem:[#allocation7 + $0x80] sm:$0xff]  ;;  %v244_v52 = vld [vmem:[#allocation7 + $0x88] sm:$0xff] }
  0x42   :  { %972 = vmatpush3.bf16.msra.mxu0 %v971_v14  ;;  %v165_v49 = vld [vmem:[#allocation7 + $0x78] sm:$0xff]  ;;  %v245_v53 = vld [vmem:[#allocation7 + $0x90] sm:$0xff]  ;;  %v1013_v54 = vpack.c.bf16 %v244_v52, %v243_v51  ;;  %v247_v57 = vld [vmem:[#allocation7 + $0xa0] sm:$0xff] }
  0x43   :  { %973 = vmatprep.subr.bf16.mxu0 %v1220_v0  ;;  %v1010_v50 = vpack.c.bf16 %v165_v49, %v164_v48  ;;  %v246_v55 = vld [vmem:[#allocation7 + $0x98] sm:$0xff]  ;;  %v248_v58 = vld [vmem:[#allocation7 + $0xa8] sm:$0xff]  ;;  %v249_v60 = vld [vmem:[#allocation7 + $0xb0] sm:$0xff] }
  0x44   :  { %996 = vmatpush3.bf16.msra.mxu1 %v995_v24  ;;  %v1016_v56 = vpack.c.bf16 %v246_v55, %v245_v53  ;;  %v1019_v59 = vpack.c.bf16 %v248_v58, %v247_v57  ;;  %v250_v61 = vld [vmem:[#allocation7 + $0xb8] sm:$0xff]  ;;  %v251_v63 = vld [vmem:[#allocation7 + $0xc0] sm:$0xff]  ;;  %v252_v2 = vld [vmem:[#allocation7 + $0xc8] sm:$0xff] }
  0x45   :  { %997 = vmatprep.subr.bf16.mxu1 %v1220_v0  ;;  %v1022_v62 = vpack.c.bf16 %v250_v61, %v249_v60  ;;  %v1025_v3 = vpack.c.bf16 %v252_v2, %v251_v63  ;;  %v253_v4 = vld [vmem:[#allocation7 + $0xd0] sm:$0xff]  ;;  %v254_v5 = vld [vmem:[#allocation7 + $0xd8] sm:$0xff]  ;;  %v255_v7 = vld [vmem:[#allocation7 + $0xe0] sm:$0xff] }
  0x46   :  { %975 = vmatpush3.bf16.msra.mxu0 %v974_v21  ;;  %v1028_v6 = vpack.c.bf16 %v254_v5, %v253_v4  ;;  %v256_v8 = vld [vmem:[#allocation7 + $0xe8] sm:$0xff]  ;;  %v646_v10 = vld [vmem:[%s1384_s3] ss:$0 sm:$0xff]  ;;  %v257_v15 = vld [vmem:[#allocation7 + $0xf0] sm:$0xff] }
  0x47   :  { %976 = vmatprep.subr.bf16.mxu0 %v1220_v0  ;;  %v1031_v9 = vpack.c.bf16 %v256_v8, %v255_v7  ;;  %v258_v16 = vld [vmem:[#allocation7 + $0xf8] sm:$0xff]  ;;  %v336_v18 = vld [vmem:[#allocation7 + $0x100] sm:$0xff]  ;;  %v337_v19 = vld [vmem:[#allocation7 + $0x108] sm:$0xff] }
  0x48   :  { %999 = vmatpush3.bf16.msra.mxu1 %v998_v30  ;;  %v1034_v17 = vpack.c.bf16 %v258_v16, %v257_v15  ;;  %v338_v20 = vld [vmem:[#allocation7 + $0x110] sm:$0xff]  ;;  %v1037_v21 = vpack.c.bf16 %v337_v19, %v336_v18  ;;  %v339_v22 = vld [vmem:[#allocation7 + $0x118] sm:$0xff]  ;;  %v340_v24 = vld [vmem:[#allocation7 + $0x120] sm:$0xff] }
  0x49   :  { %1000 = vmatprep.subr.bf16.mxu1 %v1220_v0  ;;  %v1040_v23 = vpack.c.bf16 %v339_v22, %v338_v20  ;;  %v341_v25 = vld [vmem:[#allocation7 + $0x128] sm:$0xff]  ;;  %v343_v28 = vld [vmem:[#allocation7 + $0x138] sm:$0xff]  ;;  %v344_v30 = vld [vmem:[#allocation7 + $0x140] sm:$0xff] }
  0x4a   :  { %978 = vmatpush3.bf16.msra.mxu0 %v977_v27  ;;  %v1043_v26 = vpack.c.bf16 %v341_v25, %v340_v24  ;;  %v342_v27 = vld [vmem:[#allocation7 + $0x130] sm:$0xff]  ;;  %v345_v31 = vld [vmem:[#allocation7 + $0x148] sm:$0xff]  ;;  %v347_v34 = vld [vmem:[#allocation7 + $0x158] sm:$0xff] }
  0x4b   :  { %979 = vmatprep.subr.bf16.mxu0 %v1220_v0  ;;  %v1046_v29 = vpack.c.bf16 %v343_v28, %v342_v27  ;;  %v1049_v32 = vpack.c.bf16 %v345_v31, %v344_v30  ;;  %v349_v37 = vld [vmem:[#allocation7 + $0x168] sm:$0xff]  ;;  %v350_v44 = vld [vmem:[#allocation7 + $0x170] sm:$0xff]  ;;  %v432_v51 = vld [vmem:[#allocation7 + $0x198] sm:$0xff] }
  0x4c   :  { %1002 = vmatpush3.bf16.msra.mxu1 %v1001_v36  ;;  %v348_v36 = vld [vmem:[#allocation7 + $0x160] sm:$0xff]  ;;  %v430_v48 = vld [vmem:[#allocation7 + $0x188] sm:$0xff]  ;;  %v431_v49 = vld [vmem:[#allocation7 + $0x190] sm:$0xff] }
  0x4d   :  { %1003 = vmatprep.subr.bf16.mxu1 %v1220_v0  ;;  %v1055_v38 = vpack.c.bf16 %v349_v37, %v348_v36  ;;  %v1064_v52 = vpack.c.bf16 %v432_v51, %v431_v49  ;;  %v433_v53 = vld [vmem:[#allocation7 + $0x1a0] sm:$0xff]  ;;  %v436_v57 = vld [vmem:[#allocation7 + $0x1b8] sm:$0xff]  ;;  %v438_v60 = vld [vmem:[#allocation7 + $0x1c8] sm:$0xff] }
  0x4e   :  { %981 = vmatpush3.bf16.msra.mxu0 %v980_v33  ;;  %v346_v33 = vld [vmem:[#allocation7 + $0x150] sm:$0xff]  ;;  %v440_v63 = vld [vmem:[#allocation7 + $0x1d8] sm:$0xff]  ;;  %v442_v4 = vld [vmem:[#allocation7 + $0x1e8] sm:$0xff] }
  0x4f   :  { %982 = vmatprep.subr.bf16.mxu0 %v1220_v0  ;;  %v1052_v35 = vpack.c.bf16 %v347_v34, %v346_v33  ;;  %v523_v15 = vld [vmem:[#allocation7 + $0x208] sm:$0xff]  ;;  %v524_v16 = vld [vmem:[#allocation7 + $0x210] sm:$0xff]  ;;  %v525_v18 = vld [vmem:[#allocation7 + $0x218] sm:$0xff] }
  0x50   :  { %1005 = vmatpush3.bf16.msra.mxu1 %v1004_v42  ;;  %v1088_v19 = vpack.c.bf16 %v525_v18, %v524_v16  ;;  %v526_v20 = vld [vmem:[#allocation7 + $0x220] sm:$0xff]  ;;  %v532_v28 = vld [vmem:[#allocation7 + $0x250] sm:$0xff]  ;;  %v649_v34 = vld [vmem:[%s1384_s3 + $0x3] ss:$0 sm:$0xff] }
  0x51   :  { %1006 = vmatprep.subr.bf16.mxu1 %v1220_v0  ;;  %v530_v25 = vld [vmem:[#allocation7 + $0x240] sm:$0xff] }
  0x52   :  { %984 = vmatpush3.bf16.msra.mxu0 %v983_v39  ;;  %v647_v39 = vld [vmem:[%s1384_s3 + $0x1] ss:$0 sm:$0xff]  ;;  %v534_v31 = vld [vmem:[#allocation7 + $0x260] sm:$0xff] }
  0x53   :  { %985 = vmatprep.subr.bf16.mxu0 %v1220_v0 }
  0x54   :  { %1008 = vmatpush3.bf16.msra.mxu1 %v1007_v46 }
  0x55   :  { %1009 = vmatprep.subr.bf16.mxu1 %v1220_v0 }
  0x56   :  { %987 = vmatpush3.bf16.msra.mxu0 %v986_v45  ;;  %v351_v45 = vld [vmem:[#allocation7 + $0x178] sm:$0xff] }
  0x57   :  { %1012 = vmatprep.subr.bf16.mxu0 %v1220_v0  ;;  %v1058_v46 = vpack.c.bf16 %v351_v45, %v350_v44 }
  0x58   :  { %1011 = vmatpush3.bf16.msra.mxu1 %v1010_v50 }
  0x59   :  { %787 = vmatmul.mubr.f32.vlgmr.msra.gmra.mrb[0].mxu0 %v57_v47  ;;  %1036 = vmatprep.subr.bf16.mxu1 %v1220_v0  ;;  %v429_v47 = vld [vmem:[#allocation7 + $0x180] sm:$0xff] }
  0x5a   :  { %856 = vmatprep.mubr.msk.f32.mxu0 %vm1221_vm0, %v1222_v1  ;;  %1014 = vmatpush3.bf16.msra.mxu0 %v1013_v54  ;;  %v1061_v50 = vpack.c.bf16 %v430_v48, %v429_v47  ;;  %v434_v54 = vld [vmem:[#allocation7 + $0x1a8] sm:$0xff]  ;;  %v651_v47 = vld [vmem:[%s1384_s3 + $0x5] ss:$0 sm:$0xff] }
  0x5b   :  { %1015 = vmatprep.subr.bf16.mxu0 %v1220_v0  ;;  %v1067_v55 = vpack.c.bf16 %v434_v54, %v433_v53 }
  0x5e   :  { %1017 = vmatpush3.bf16.msra.mxu0 %v1016_v56  ;;  %v435_v56 = vld [vmem:[#allocation7 + $0x1b0] sm:$0xff] }
  0x5f   :  { %1018 = vmatprep.subr.bf16.mxu0 %v1220_v0  ;;  %v1070_v58 = vpack.c.bf16 %v436_v57, %v435_v56 }
  0x62   :  { %1020 = vmatpush3.bf16.msra.mxu0 %v1019_v59  ;;  %v437_v59 = vld [vmem:[#allocation7 + $0x1c0] sm:$0xff] }
  0x63   :  { %1021 = vmatprep.subr.bf16.mxu0 %v1220_v0  ;;  %v1073_v61 = vpack.c.bf16 %v438_v60, %v437_v59 }
  0x66   :  { %1023 = vmatpush3.bf16.msra.mxu0 %v1022_v62  ;;  %v439_v62 = vld [vmem:[#allocation7 + $0x1d0] sm:$0xff] }
  0x67   :  { %1024 = vmatprep.subr.bf16.mxu0 %v1220_v0  ;;  %v1076_v2 = vpack.c.bf16 %v440_v63, %v439_v62 }
  0x6a   :  { %1026 = vmatpush3.bf16.msra.mxu0 %v1025_v3  ;;  %v441_v3 = vld [vmem:[#allocation7 + $0x1e0] sm:$0xff] }
  0x6b   :  { %1027 = vmatprep.subr.bf16.mxu0 %v1220_v0  ;;  %v1079_v5 = vpack.c.bf16 %v442_v4, %v441_v3 }
  0x6e   :  { %1029 = vmatpush3.bf16.msra.mxu0 %v1028_v6  ;;  %v648_v6 = vld [vmem:[%s1384_s3 + $0x2] ss:$0 sm:$0xff] }
  0x6f   :  { %1030 = vmatprep.subr.bf16.mxu0 %v1220_v0 }
  0x72   :  { %1032 = vmatpush3.bf16.msra.mxu0 %v1031_v9 }
  0x73   :  { %1033 = vmatprep.subr.bf16.mxu0 %v1220_v0 }
  0x76   :  { %1035 = vmatpush3.bf16.msra.mxu0 %v1034_v17 }
  0x77   :  { %1060 = vmatprep.subr.bf16.mxu0 %v1220_v0 }
 0x12c   :  { %v145_v11 = vpop.f32.mrb[0].mxu0 }
 0x12d   :  { %v146_v12 = vadd.f32 %v646_v10, %v145_v11  ;;  %v788_v13 = vpop.f32.mrb[1].mxu0  ;;  %v443_v11 = vld [vmem:[#allocation7 + $0x1f0] sm:$0xff] }
 0x12f   :  { %v149_v14 = vmax.f32 %v146_v12, 0.0  ;;  %v444_v12 = vld [vmem:[#allocation7 + $0x1f8] sm:$0xff] }
 0x130   :  { %v1082_v13 = vpack.c.bf16 %v444_v12, %v443_v11 }
 0x131   :  { %822 = vmatmul.mubr.f32.vlgmr.msra.gmra.mrb[0].mxu1 %v149_v14  ;;  %v522_v14 = vld [vmem:[#allocation7 + $0x200] sm:$0xff] }
 0x132   :  { %891 = vmatprep.mubr.msk.f32.mxu1 %vm1221_vm0, %v1222_v1  ;;  %1038 = vmatpush3.bf16.msra.mxu1 %v1037_v21  ;;  %v1085_v17 = vpack.c.bf16 %v523_v15, %v522_v14  ;;  %v527_v21 = vld [vmem:[#allocation7 + $0x228] sm:$0xff] }
 0x133   :  { %1039 = vmatprep.subr.bf16.mxu1 %v1220_v0  ;;  %v1091_v22 = vpack.c.bf16 %v527_v21, %v526_v20 }
 0x136   :  { %1041 = vmatpush3.bf16.msra.mxu1 %v1040_v23  ;;  %v529_v23 = vld [vmem:[#allocation7 + $0x238] sm:$0xff] }
 0x137   :  { %1042 = vmatprep.subr.bf16.mxu1 %v1220_v0 }
 0x13a   :  { %1044 = vmatpush3.bf16.msra.mxu1 %v1043_v26  ;;  %v531_v26 = vld [vmem:[#allocation7 + $0x248] sm:$0xff] }
 0x13b   :  { %1045 = vmatprep.subr.bf16.mxu1 %v1220_v0  ;;  %v1097_v27 = vpack.c.bf16 %v531_v26, %v530_v25 }
 0x13e   :  { %1047 = vmatpush3.bf16.msra.mxu1 %v1046_v29  ;;  %v533_v29 = vld [vmem:[#allocation7 + $0x258] sm:$0xff] }
 0x13f   :  { %1048 = vmatprep.subr.bf16.mxu1 %v1220_v0  ;;  %v1100_v30 = vpack.c.bf16 %v533_v29, %v532_v28 }
 0x142   :  { %1050 = vmatpush3.bf16.msra.mxu1 %v1049_v32  ;;  %v535_v32 = vld [vmem:[#allocation7 + $0x268] sm:$0xff] }
 0x143   :  { %1051 = vmatprep.subr.bf16.mxu1 %v1220_v0  ;;  %v1103_v33 = vpack.c.bf16 %v535_v32, %v534_v31 }
 0x146   :  { %1053 = vmatpush3.bf16.msra.mxu1 %v1052_v35 }
 0x147   :  { %1054 = vmatprep.subr.bf16.mxu1 %v1220_v0 }
 0x14a   :  { %1056 = vmatpush3.bf16.msra.mxu1 %v1055_v38 }
 0x14b   :  { %1057 = vmatprep.subr.bf16.mxu1 %v1220_v0 }
 0x14e   :  { %1059 = vmatpush3.bf16.msra.mxu1 %v1058_v46  ;;  %v614_v46 = vlaneseq }
 0x14f   :  { %1084 = vmatprep.subr.bf16.mxu1 %v1220_v0 }
 0x150   :  { %v615_v48 = vand.u32 127, %v614_v46 }
 0x152   :  { %vm616_vm1 = vcmp.lt.s32.totalorder %v615_v48, 10 }
 0x204   :  { %v237_v40 = vpop.f32.mrb[0].mxu1 }
 0x205   :  { %v238_v41 = vadd.f32 %v647_v39, %v237_v40  ;;  %v823_v42 = vpop.f32.mrb[1].mxu1  ;;  %v536_v39 = vld [vmem:[#allocation7 + $0x270] sm:$0xff]  ;;  %v537_v40 = vld [vmem:[#allocation7 + $0x278] sm:$0xff] }
 0x206   :  { %v650_v42 = vld [vmem:[%s1384_s3 + $0x4] ss:$0 sm:$0xff]  ;;  %s636_s3 = sshll.u32 %s1223_s10, 4  ;;  %s637_s3 = int_to_ptr.vmem [resolvable:$true] %s636_s3 }
 0x207   :  { %v241_v43 = vmax.f32 %v238_v41, 0.0  ;;  %v1106_v41 = vpack.c.bf16 %v537_v40, %v536_v39  ;;  %s1187_s11 = scalar_lea.vmem %s637_s3, 128  ;;  %p1192_p11 = scmp.lt.s32.totalorder %s637_s3, %s637_s3 }
 0x208   :  { %p1188_p10 = scmp.ne.s32.totalorder %s637_s3, %s1187_s11  ;;  %p1193_p12 = scmp.lt.s32.totalorder %s1187_s11, %s1187_s11 }
 0x209   :  { %857 = vmatmul.mubr.f32.vlgmr.msra.gmra.mrb[2].mxu0 %v241_v43 }
 0x20a   :  { %926 = vmatprep.mubr.msk.f32.mxu0 %vm1221_vm0, %v1222_v1  ;;  %1062 = vmatpush3.bf16.msra.mxu0 %v1061_v50  ;;  %p1194_p13 = por %p1193_p12, %p1192_p11 }
 0x20b   :  { %1063 = vmatprep.subr.bf16.mxu0 %v1220_v0 }
 0x20c   :  { %p1195_p0 = pnand %p1194_p13, %p1188_p10 }
 0x20e   :  { %1065 = vmatpush3.bf16.msra.mxu0 %v1064_v52 }
 0x20f   :  { %1066 = vmatprep.subr.bf16.mxu0 %v1220_v0 }
 0x212   :  { %1068 = vmatpush3.bf16.msra.mxu0 %v1067_v55 }
 0x213   :  { %1069 = vmatprep.subr.bf16.mxu0 %v1220_v0 }
 0x216   :  { %1071 = vmatpush3.bf16.msra.mxu0 %v1070_v58 }
 0x217   :  { %1072 = vmatprep.subr.bf16.mxu0 %v1220_v0 }
 0x21a   :  { %1074 = vmatpush3.bf16.msra.mxu0 %v1073_v61 }
 0x21b   :  { %1075 = vmatprep.subr.bf16.mxu0 %v1220_v0 }
 0x21e   :  { %1077 = vmatpush3.bf16.msra.mxu0 %v1076_v2 }
 0x21f   :  { %1078 = vmatprep.subr.bf16.mxu0 %v1220_v0 }
 0x222   :  { %1080 = vmatpush3.bf16.msra.mxu0 %v1079_v5 }
 0x223   :  { %1081 = vmatprep.subr.bf16.mxu0 %v1220_v0 }
 0x226   :  { %1083 = vmatpush3.bf16.msra.mxu0 %v1082_v13 }
 0x2dc   :  { %v330_v7 = vpop.f32.mrb[2].mxu0 }
 0x2dd   :  { %v331_v8 = vadd.f32 %v648_v6, %v330_v7  ;;  %v858_v9 = vpop.f32.mrb[3].mxu0 }
 0x2df   :  { %v334_v10 = vmax.f32 %v331_v8, 0.0 }
 0x2e1   :  { %892 = vmatmul.mubr.f32.vlgmr.msra.gmra.mrb[2].mxu1 %v334_v10 }
 0x2e2   :  { %961 = vmatprep.mubr.msk.f32.mxu1 %vm1221_vm0, %v1222_v1  ;;  %1086 = vmatpush3.bf16.msra.mxu1 %v1085_v17  ;;  %v528_v1 = vld [vmem:[#allocation7 + $0x230] sm:$0xff] }
 0x2e3   :  { %1087 = vmatprep.subr.bf16.mxu1 %v1220_v0  ;;  %v1094_v24 = vpack.c.bf16 %v529_v23, %v528_v1 }
 0x2e6   :  { %1089 = vmatpush3.bf16.msra.mxu1 %v1088_v19 }
 0x2e7   :  { %1090 = vmatprep.subr.bf16.mxu1 %v1220_v0 }
 0x2ea   :  { %1092 = vmatpush3.bf16.msra.mxu1 %v1091_v22 }
 0x2eb   :  { %1093 = vmatprep.subr.bf16.mxu1 %v1220_v0 }
 0x2ee   :  { %1095 = vmatpush3.bf16.msra.mxu1 %v1094_v24 }
 0x2ef   :  { %1096 = vmatprep.subr.bf16.mxu1 %v1220_v0 }
 0x2f2   :  { %1098 = vmatpush3.bf16.msra.mxu1 %v1097_v27 }
 0x2f3   :  { %1099 = vmatprep.subr.bf16.mxu1 %v1220_v0 }
 0x2f6   :  { %1101 = vmatpush3.bf16.msra.mxu1 %v1100_v30 }
 0x2f7   :  { %1102 = vmatprep.subr.bf16.mxu1 %v1220_v0 }
 0x2fa   :  { %1104 = vmatpush3.bf16.msra.mxu1 %v1103_v33 }
 0x2fb   :  { %1105 = vmatprep.subr.bf16.mxu1 %v1220_v0 }
 0x2fe   :  { %1107 = vmatpush3.bf16.msra.mxu1 %v1106_v41 }
 0x3b4   :  { %v423_v35 = vpop.f32.mrb[2].mxu1 }
 0x3b5   :  { %v424_v36 = vadd.f32 %v649_v34, %v423_v35  ;;  %v893_v37 = vpop.f32.mrb[3].mxu1 }
 0x3b7   :  { %v427_v38 = vmax.f32 %v424_v36, 0.0 }
 0x3b9   :  { %927 = vmatmul.mubr.f32.vlgmr.msra.gmra.mrb[4].mxu0 %v427_v38 }
 0x48c   :  { %v516_v43 = vpop.f32.mrb[4].mxu0 }
 0x48d   :  { %v517_v44 = vadd.f32 %v650_v42, %v516_v43  ;;  %v928_v0 = vpop.f32.mrb[5].mxu0 }
 0x48f   :  { %v520_v45 = vmax.f32 %v517_v44, 0.0 }
 0x491   :  { %962 = vmatmul.mubr.f32.vlgmr.msra.gmra.mrb[4].mxu1 %v520_v45 }
 0x564   :  { %v609_v49 = vpop.f32.mrb[4].mxu1 }
 0x565   :  { %v610_v50 = vadd.f32 %v651_v47, %v609_v49  ;;  %v963_v51 = vpop.f32.mrb[5].mxu1 }
 0x567   :  { %v613_v52 = vmax.f32 %v610_v50, 0.0 }
 0x569   :  { %v617_v53 = vsel %vm616_vm1, %v613_v52, -1e+30 }
 0x56a   :  { %618 = vmax.xlane.f32.xlu0 %v617_v53 }
 0x5f7   :  { %v619_v54 = vpop.xlane.xlu0 %618 }
 0x5f8   :  { %v620_v55 = vsub.f32 %v617_v53, %v619_v54 }
 0x5fa   :  { %v621_v56 = vmul.f32 1.442695, %v620_v55 }
 0x5fc   :  { %1117 = vpow2.f32 %v621_v56 }
 0x606   :  { %v1118_v57 = vpop.eup %1117 }
 0x607   :  { %v623_v58 = vsel %vm616_vm1, %v1118_v57, 0.0 }
 0x608   :  { %624 = vadd.xlane.f32.xlu0 %v623_v58 }
 0x695   :  { %v625_v59 = vpop.xlane.xlu0 %624 }
 0x696   :  { %1119 = vlog2.f32 %v625_v59 }
 0x6a0   :  { %v1120_v60 = vpop.eup %1119 }
 0x6a1   :  { %v627_v61 = vmul.f32 0.6931472, %v1120_v60 }
 0x6a3   :  { %v628_v62 = vsub.f32 %v620_v55, %v627_v61 }
 0x6a5   :  { %629 = vst [vmem:[#allocation8] sm:$0xff] %v628_v62 }
 0x6a6   :  { %1198 = shalt.err (!%p1195_p0)
}
 0x6a7   :  { %s1199_s1 = scalar_lea.hbm %s1385_s4, 128 }
 0x6a8   :  { %p1200_p1 = scmp.ne.s32.totalorder %s1385_s4, %s1199_s1  ;;  %p1203_p2 = scmp.lt.u32.totalorder %s1199_s1, %s1385_s4 }
 0x6aa   :  { %p1205_p3 = pnand %p1203_p2, %p1200_p1 }
 0x6ac   :  { %1208 = shalt.err (!%p1205_p3)
}
 0x6ad   :  { %639 = dma.vmem_to_hbm [thread:$0]  %s637_s3, 128, %s1385_s4, [#allocation4]  }
 0x6ae   :  { %1213 = dma.done.wait [#allocation4], 128  }
 0x6af   :  { %1214 = vsyncadd [#allocation4], 4294967168 }
 0x6b0   :  { %643 = vsyncpa [#allocation3], 1 }
 0x6b1   :  { %644 = vsyncpa [#allocation6], 1 }
 0x6b2   :  { %645 = vsyncpa [#allocation4], 1 }

</bundles_post_ra>
